<compile_context>
chip_gen: v7x
topology: tpu7x:2x2x1
jax: 0.10.0
libtpu: 0.0.40
codegen_flags: <defaults>
</compile_context>

<pallas_src>
import functools

import jax
import jax.numpy as jnp
from jax import lax
from jax.experimental import pallas as pl
from jax.experimental.pallas import tpu as pltpu

SCALE = 32.0
MARGIN = 0.25


def _round_up(x, m):
    return ((x + m - 1) // m) * m


def _normalize_kernel(x_ref, o_ref):
    """Row-wise L2 normalize: x * rsqrt(max(||x||^2, eps^2)) == x / max(||x||, eps)."""
    x = x_ref[...].astype(jnp.float32)
    sq = jnp.sum(x * x, axis=-1, keepdims=True)
    inv = lax.rsqrt(jnp.maximum(sq, 1e-24))   # eps=1e-12 on the norm -> 1e-24 on sq
    o_ref[...] = (x * inv).astype(o_ref.dtype)


def _circle_tile_kernel(xn_ref, xnt_ref, labc_ref, labr_ref, out_ref,
                        lp_acc, ln_acc, *, scale, margin, n_valid, tm, tn):
    i = pl.program_id(0)
    j = pl.program_id(1)

    @pl.when(j == 0)
    def _():
        lp_acc[...] = jnp.zeros_like(lp_acc)
        ln_acc[...] = jnp.zeros_like(ln_acc)

    # (tm, D) @ (D, tn) on the MXU, f32 accumulate, no in-kernel transpose.
    sim = jnp.dot(xn_ref[...], xnt_ref[...], preferred_element_type=jnp.float32)

    lab_c = labc_ref[...]                      # (tm, 1) int32
    lab_r = labr_ref[...]                      # (1, tn) int32
    same = lab_c == lab_r                      # (tm, tn)

    row_g = i * tm + lax.broadcasted_iota(jnp.int32, (tm, tn), 0)
    col_g = j * tn + lax.broadcasted_iota(jnp.int32, (tm, tn), 1)
    valid = col_g < n_valid                    # mask padded columns
    pos_mask = same & (row_g != col_g) & valid
    neg_mask = (~same) & valid

    # Single fused exponential: pos/neg masks are disjoint, so one exp feeds
    # both row sums (diag / padded entries are masked to 0 in both).
    arg_p = (-scale) * jnp.maximum(1.0 + margin - sim, 0.0) * (sim - (1.0 - margin))
    arg_n = scale * jnp.maximum(sim + margin, 0.0) * (sim - margin)
    e = jnp.exp(jnp.where(pos_mask, arg_p, arg_n))

    lp_acc[...] += jnp.sum(jnp.where(pos_mask, e, 0.0), axis=1, keepdims=True)
    ln_acc[...] += jnp.sum(jnp.where(neg_mask, e, 0.0), axis=1, keepdims=True)

    @pl.when(j == pl.num_programs(1) - 1)
    def _():
        # TODO(synk): the PyTorch sum-of-exp form can overflow f32 for extreme
        # sims; a log-sum-exp rewrite would be more robust but changes semantics
        # only at overflow, so the original formulation is kept.
        out_ref[...] = jnp.log1p(lp_acc[...] * ln_acc[...])


def circle_loss(feats, labels, *, scale=SCALE, margin=MARGIN):
    B, D = feats.shape
    labels = labels.astype(jnp.int32)

    # Tile selection: single full tile for small B; (256, 512) for large B
    # (keeps double-buffered blocks well under v7x's 64 MiB VMEM).
    if B <= 512:
        tm = tn = _round_up(B, 8)
        Bp = tm
    else:
        tm, tn = 256, 512
        Bp = _round_up(B, 512)                 # lcm(tm, tn)

    feats_p = feats if Bp == B else jnp.pad(feats, ((0, Bp - B), (0, 0)))
    labels_p = labels if Bp == B else jnp.pad(labels, (0, Bp - B), constant_values=-1)

    # Pass 1: normalization (rsqrt path), tiled over rows, native dtype kept.
    xn = pl.pallas_call(
        _normalize_kernel,
        out_shape=jax.ShapeDtypeStruct((Bp, D), feats.dtype),
        grid=(Bp // tm,),
        in_specs=[pl.BlockSpec((tm, D), lambda i: (i, 0))],
        out_specs=pl.BlockSpec((tm, D), lambda i: (i, 0)),
        compiler_params=pltpu.CompilerParams(dimension_semantics=("parallel",)),
    )(feats_p)

    # Wrapper-side layout plumbing: RHS presented as [D, Bp] so the kernel
    # contracts (1, 0) — no per-tile XLU transpose inside the grid loop.
    xn_t = xn.T
    lab_col = labels_p.reshape(Bp, 1)
    lab_row = labels_p.reshape(1, Bp)

    kernel = functools.partial(
        _circle_tile_kernel,
        scale=float(scale), margin=float(margin), n_valid=B, tm=tm, tn=tn)

    per_row = pl.pallas_call(
        kernel,
        out_shape=jax.ShapeDtypeStruct((Bp, 1), jnp.float32),
        grid_spec=pltpu.PrefetchScalarGridSpec(
            num_scalar_prefetch=0,
            grid=(Bp // tm, Bp // tn),
            in_specs=[
                pl.BlockSpec((tm, D), lambda i, j: (i, 0)),   # xn rows
                pl.BlockSpec((D, tn), lambda i, j: (0, j)),   # xn^T cols
                pl.BlockSpec((tm, 1), lambda i, j: (i, 0)),   # labels (col)
                pl.BlockSpec((1, tn), lambda i, j: (0, j)),   # labels (row)
            ],
            out_specs=pl.BlockSpec((tm, 1), lambda i, j: (i, 0)),
            scratch_shapes=[pltpu.VMEM((tm, 1), jnp.float32),
                            pltpu.VMEM((tm, 1), jnp.float32)],
        ),
        compiler_params=pltpu.CompilerParams(
            dimension_semantics=("parallel", "arbitrary")),
    )(xn, xn_t, lab_col, lab_row)

    return jnp.sum(per_row[:B, 0]) / jnp.float32(B)


if __name__ == "__main__":
    key = jax.random.PRNGKey(0)
    B, D = 8, 32
    kf, kl = jax.random.split(key)
    feats = jax.random.normal(kf, (B, D), dtype=jnp.float32)
    labels = jax.random.randint(kl, (B,), 0, 3, dtype=jnp.int32)

    loss = circle_loss(feats, labels)
    jax.block_until_ready(loss)

    # Pure-JAX reference (same math as the PyTorch module).
    xn_ref = feats / jnp.maximum(
        jnp.sqrt(jnp.sum(feats * feats, axis=-1, keepdims=True)), 1e-12)
    sim = xn_ref @ xn_ref.T
    same = labels[:, None] == labels[None, :]
    eye = jnp.eye(B, dtype=bool)
    pos_mask = same & ~eye
    neg_mask = ~same
    ap = jnp.maximum(1.0 + MARGIN - sim, 0.0)
    an = jnp.maximum(sim + MARGIN, 0.0)
    lp = jnp.sum(jnp.where(pos_mask, jnp.exp(-SCALE * ap * (sim - (1 - MARGIN))), 0.0), axis=1)
    ln = jnp.sum(jnp.where(neg_mask, jnp.exp(SCALE * an * (sim - MARGIN)), 0.0), axis=1)
    ref = jnp.mean(jnp.log1p(lp * ln))

    assert jnp.allclose(loss, ref, rtol=1e-4, atol=1e-4), (loss, ref)
    print("KERNEL_OK")
</pallas_src>

<mosaic_0001>
module attributes {stable_mosaic.version = 11 : i64} {
  func.func @_normalize_kernel(%arg0: i32, %arg1: memref<8x32xf32, #tpu.memory_space<vmem>>, %arg2: memref<8x32xf32, #tpu.memory_space<vmem>>) attributes {dimension_semantics = [#tpu.dimension_semantics<parallel>], iteration_bounds = array<i64: 1>, scalar_prefetch = 0 : i64, scratch_operands = 0 : i64, tpu.core_type = #tpu.core_type<tc>, window_params = [{transform_indices = @transform_0, window_bounds = array<i64: 8, 32>}, {transform_indices = @transform_1, window_bounds = array<i64: 8, 32>}]} {
    %c0 = arith.constant 0 : index
    %c0_0 = arith.constant 0 : index
    %0 = vector.load %arg1[%c0, %c0_0] : memref<8x32xf32, #tpu.memory_space<vmem>>, vector<8x32xf32>
    %1 = arith.mulf %0, %0 : vector<8x32xf32>
    %cst = arith.constant dense<0.000000e+00> : vector<8xf32>
    %2 = vector.multi_reduction <add>, %1, %cst [1] : vector<8x32xf32> to vector<8xf32>
    %3 = vector.shape_cast %2 : vector<8xf32> to vector<8x1xf32>
    %cst_1 = arith.constant 1.000000e-24 : f32
    %4 = vector.broadcast %cst_1 : f32 to vector<8x1xf32>
    %5 = arith.maximumf %3, %4 : vector<8x1xf32>
    %6 = math.rsqrt %5 : vector<8x1xf32>
    %7 = vector.broadcast %6 : vector<8x1xf32> to vector<8x32xf32>
    %8 = arith.mulf %0, %7 : vector<8x32xf32>
    %c0_2 = arith.constant 0 : index
    %c0_3 = arith.constant 0 : index
    %9 = vector.load %arg2[%c0_2, %c0_3] : memref<8x32xf32, #tpu.memory_space<vmem>>, vector<8x32xf32>
    tpu.vector_store %arg2[%c0_2, %c0_3], %8 {strides = array<i32>} : memref<8x32xf32, #tpu.memory_space<vmem>>, vector<8x32xf32>,
    return
  }
  func.func @transform_0(%arg0: i32) -> (i32, i32) {
    %c0_i32 = arith.constant 0 : i32
    %c0_i32_0 = arith.constant 0 : i32
    return %arg0, %c0_i32 : i32, i32
  }
  func.func @transform_1(%arg0: i32) -> (i32, i32) {
    %c0_i32 = arith.constant 0 : i32
    %c0_i32_0 = arith.constant 0 : i32
    return %arg0, %c0_i32 : i32, i32
  }
}

</mosaic_0001>

<bundles_post_ra>
// kernel: tpu_custom_call.1
= control target key start
LH: loop header
LB: loop body
LE: loop exit
PB: predicated region body
PF: predicated region fallthrough
CT: control target
= control target key end

     0   :  { %6 = vsyncpa [#allocation3], 0  ;;  %s134_s0 = inlined_call_operand.hbm [shape: f32[8,32], index: 0, kind: input, shape index: {}]   ;;  %s135_s1 = inlined_call_operand.hbm [shape: f32[8,32], index: 1, kind: output, shape index: {}]  }
   0x1   :  { %7 = vsyncpa [#allocation4], 0  ;;  %s98_s6 = smov [#allocation2]   ;;  %s50_s10 = scalar_lea.hbm %s134_s0, 128 }
   0x2   :  { %s14_s7 = sshll.u32 %s98_s6, 4  ;;  %p51_p0 = scmp.ne.s32.totalorder %s134_s0, %s50_s10  ;;  %s15_s7 = int_to_ptr.vmem [resolvable:$true] %s14_s7 }
   0x3   :  { %p54_p1 = scmp.lt.u32.totalorder %s50_s10, %s134_s0 }
   0x5   :  { %p56_p2 = pnand %p54_p1, %p51_p0 }
   0x7   :  { %59 = shalt.err (!%p56_p2)
}
   0x8   :  { %s60_s15 = scalar_lea.vmem %s15_s7, 128  ;;  %p65_p4 = scmp.lt.s32.totalorder %s15_s7, %s15_s7 }
   0x9   :  { %p61_p3 = scmp.ne.s32.totalorder %s15_s7, %s60_s15  ;;  %p66_p5 = scmp.lt.s32.totalorder %s60_s15, %s60_s15 }
   0xb   :  { %p67_p6 = por %p66_p5, %p65_p4 }
   0xd   :  { %p68_p7 = pnand %p67_p6, %p61_p3 }
   0xf   :  { %71 = shalt.err (!%p68_p7)
}
  0x10   :  { %17 = dma.hbm_to_vmem [thread:$0]  %s134_s0, 128, %s15_s7, [#allocation3]  }
  0x11   :  { %94 = dma.done.wait [#allocation3], 128  }
  0x12   :  { %95 = vsyncadd [#allocation3], 4294967168  ;;  %v21_v0 = vld [vmem:[#allocation2] sm:$0xff]  ;;  %vm23_vm0 = vcmask 261120   ;;  %s99_s18 = smov [#allocation5]  }
  0x13   :  { %v22_v1 = vmul.f32 %v21_v0, %v21_v0  ;;  %s37_s19 = sshll.u32 %s99_s18, 4  ;;  %s38_s19 = int_to_ptr.vmem [resolvable:$true] %s37_s19 }
  0x14   :  { %s72_s20 = scalar_lea.vmem %s38_s19, 128  ;;  %p77_p9 = scmp.lt.s32.totalorder %s38_s19, %s38_s19 }
  0x15   :  { %v24_v2 = vsel %vm23_vm0, %v22_v1, 0.0  ;;  %p73_p8 = scmp.ne.s32.totalorder %s38_s19, %s72_s20  ;;  %p78_p10 = scmp.lt.s32.totalorder %s72_s20, %s72_s20 }
  0x16   :  { %25 = vadd.xlane.f32.xlu0 %v24_v2 }
  0x17   :  { %p79_p11 = por %p78_p10, %p77_p9 }
  0x19   :  { %p80_p12 = pnand %p79_p11, %p73_p8 }
  0xa3   :  { %v26_v3 = vpop.xlane.xlu0 %25 }
  0xa4   :  { %v27_v4 = vmax.f32 %v26_v3, 1e-24 }
  0xa6   :  { %48 = vrsqrt.f32 %v27_v4 }
  0xb0   :  { %v49_v5 = vpop.eup %48 }
  0xb1   :  { %v29_v6 = vmul.f32 %v49_v5, %v21_v0 }
  0xb3   :  { %30 = vst.msk [vmem:[#allocation5] sm:$0xff] %vm23_vm0, %v29_v6 }
  0xb4   :  { %83 = shalt.err (!%p80_p12)
}
  0xb5   :  { %s84_s22 = scalar_lea.hbm %s135_s1, 128 }
  0xb6   :  { %p85_p13 = scmp.ne.s32.totalorder %s135_s1, %s84_s22  ;;  %p88_p0 = scmp.lt.u32.totalorder %s84_s22, %s135_s1 }
  0xb8   :  { %p90_p1 = pnand %p88_p0, %p85_p13 }
  0xba   :  { %93 = shalt.err (!%p90_p1)
}
  0xbb   :  { %40 = dma.vmem_to_hbm [thread:$0]  %s38_s19, 128, %s135_s1, [#allocation4]  }
  0xbc   :  { %96 = dma.done.wait [#allocation4], 128  }
  0xbd   :  { %97 = vsyncadd [#allocation4], 4294967168 }
  0xbe   :  { %44 = vsyncpa [#allocation3], 1 }
  0xbf   :  { %45 = vsyncpa [#allocation4], 1 }

</bundles_post_ra>
